<compile_context>
chip_gen: v5e
topology: v5e:2x2
jax: 0.10.0
libtpu: 0.0.40
codegen_flags: <defaults>
</compile_context>

<pallas_src>
import jax
import jax.numpy as jnp
from jax.experimental import pallas as pl
from jax.experimental.pallas import tpu as pltpu


def _gatconv_kernel(x_ref, w_ref, att_src_ref, att_dst_ref, bias_ref,
                    expand_ref, src_ref, dst_ref, out_ref, alpha_t_ref):
    f32 = jnp.float32
    bf16 = jnp.bfloat16

    N = out_ref.shape[0]
    H, E = alpha_t_ref.shape

    # ---- build one-hot edge selection matrices from int32 index vectors
    #      (VPU iota + compare; no O(E*N) HBM traffic).
    n_iota = jax.lax.broadcasted_iota(jnp.int32, (E, N), 1)          # [E, N]
    S = (n_iota == src_ref[...]).astype(bf16)                        # [E, N] src one-hot
    is_dst = n_iota == dst_ref[...]                                  # [E, N] bool
    Dm = is_dst.astype(bf16)                                         # [E, N] dst one-hot
    # additive segment-max mask: 0 where dst matches, -1e30 elsewhere (FMA form,
    # no bool-mask select per head).
    neg_bias = is_dst.astype(f32) * jnp.float32(1e30) - jnp.float32(1e30)

    # ---- projection (f32 MXU) + bf16 copy for the big selection matmuls
    xp = jnp.dot(x_ref[...], w_ref[...], preferred_element_type=f32)  # [N, H*C]
    xp_bf = xp.astype(bf16)

    # ---- gather source features once; reused for src-side logits AND messages
    x_src = jnp.dot(S, xp_bf, preferred_element_type=f32)             # [E, H*C]
    x_src_bf = x_src.astype(bf16)                                     # exact (values already bf16)

    # ---- per-edge attention logits, all heads at once                [E, H]
    a_dst = jnp.dot(xp_bf, att_dst_ref[...], preferred_element_type=f32)        # [N, H]
    logit_src = jnp.dot(x_src_bf, att_src_ref[...], preferred_element_type=f32)  # [E, H]
    logit_dst = jnp.dot(Dm, a_dst.astype(bf16), preferred_element_type=f32)      # [E, H]
    logits = logit_src + logit_dst
    logits = jnp.where(logits > 0, logits, 0.2 * logits)              # leaky_relu(0.2)

    # ---- segment max per destination node (cross-sublane max has no MXU form;
    #      static per-head loop is tiny at H=2 — use fori_loop(unroll=True) if
    #      H grows beyond ~4).
    m_rows = [jnp.max(logits[:, h:h + 1] + neg_bias, axis=0, keepdims=True)
              for h in range(H)]
    m_n = jnp.concatenate(m_rows, axis=0).astype(bf16)                # [H, N]
    # per-edge max gather: m_e[e, h] = m_n[h, dst[e]]  (exact one-hot selection)
    m_e = jax.lax.dot_general(Dm, m_n, (((1,), (1,)), ((), ())),
                              preferred_element_type=f32)             # [E, H]

    # ---- segment softmax over edges grouped by dst (exp / divide in f32).
    #      Scatter + gather of the denominator contract over the edge axis of
    #      Dm directly — no materialized DT.
    ex = jnp.exp(logits - m_e)                                        # [E, H]
    denom_n = jax.lax.dot_general(Dm, ex.astype(bf16),
                                  (((0,), (0,)), ((), ())),
                                  preferred_element_type=f32)         # [N, H]
    denom_e = jnp.dot(Dm, denom_n.astype(bf16),
                      preferred_element_type=f32) + 1e-16             # [E, H]
    alpha = ex / denom_e                                              # [E, H]
    # lane-dense store: heads on sublanes, edges on lanes ([H, E]); wrapper
    # transposes back.  Avoids masked H-wide vst.msk column stores.
    alpha_t_ref[...] = alpha.T

    # ---- weight gathered source features by alpha, scatter-add to dst
    alpha_exp = jnp.dot(alpha.astype(bf16), expand_ref[...],
                        preferred_element_type=f32)                   # [E, H*C]
    msg = (x_src * alpha_exp).astype(bf16)                            # [E, H*C]
    out = jax.lax.dot_general(Dm, msg, (((0,), (0,)), ((), ())),
                              preferred_element_type=f32)             # [N, H*C]
    out_ref[...] = out + bias_ref[...]                                # single store


def _vmem_limit_bytes():
    """Generation-aware VMEM request with headroom for Mosaic internal scratch
    (v7x has only 64 MiB/TC physical; v5e/v6e have 128 MiB)."""
    try:
        cap = pltpu.get_tpu_info().vmem_capacity_bytes
    except Exception:  # fallback if the query is unavailable
        cap = 128 * 1024 * 1024
    return int(min(0.8 * cap, 100 * 1024 * 1024))


def gat_forward(x, edge_index, params, *, heads, out_ch):
    """Pallas implementation of GAT.forward (== GATConv #1 of the module).

    Returns (out, (edge_index, alpha)), matching the PyTorch module.
    """
    N = x.shape[0]
    E = edge_index.shape[1]
    H, C = heads, out_ch
    src = edge_index[0].astype(jnp.int32).reshape(E, 1)
    dst = edge_index[1].astype(jnp.int32).reshape(E, 1)

    W = params["W"].astype(jnp.float32)                       # [Fin, H*C]
    att_src, att_dst = params["att_src"], params["att_dst"]
    bias = params["bias"].reshape(1, -1).astype(jnp.float32)  # [1, H*C]

    # Block-diagonal attention vectors: one [*, H*C] x [H*C, H] matmul covers
    # all heads.
    eye = jnp.eye(H, dtype=jnp.float32)
    att_src_blk = (att_src[:, :, None] * eye[:, None, :]).reshape(H * C, H)
    att_dst_blk = (att_dst[:, :, None] * eye[:, None, :]).reshape(H * C, H)
    # Lane-repeat matrix: alpha [E,H] @ expand [H,H*C] -> per-channel alpha.
    expand = jnp.repeat(eye, C, axis=1)                       # [H, H*C]

    vmem = pl.BlockSpec(memory_space=pltpu.MemorySpace.VMEM)

    out, alpha_t = pl.pallas_call(
        _gatconv_kernel,
        out_shape=(
            jax.ShapeDtypeStruct((N, H * C), jnp.float32),
            jax.ShapeDtypeStruct((H, E), jnp.float32),   # lane-dense alpha^T
        ),
        in_specs=[vmem] * 8,
        out_specs=(vmem, vmem),
        compiler_params=pltpu.CompilerParams(
            vmem_limit_bytes=_vmem_limit_bytes()),
    )(x.astype(jnp.float32), W,
      att_src_blk.astype(jnp.bfloat16), att_dst_blk.astype(jnp.bfloat16),
      bias, expand.astype(jnp.bfloat16), src, dst)

    # Wrapper-side transpose back to PyG's [E, H] convention (layout plumbing).
    return out, (edge_index, alpha_t.T)


def _ref_forward(x, edge_index, params, *, heads, out_ch, mxu_dtype=None):
    """Pure-JAX reference of PyG GATConv (add_self_loops=False, concat=True).

    With mxu_dtype=jnp.bfloat16, values are rounded at exactly the points where
    the Pallas kernel feeds the MXU in bf16, giving a tight matched check.
    With mxu_dtype=None it is the plain f32 PyG math.
    """
    N = x.shape[0]
    H, C = heads, out_ch
    src, dst = edge_index[0], edge_index[1]
    W, att_src, att_dst, bias = (params["W"], params["att_src"],
                                 params["att_dst"], params["bias"])
    if mxu_dtype is None:
        q = lambda a: a
    else:
        q = lambda a: a.astype(mxu_dtype).astype(jnp.float32)

    xp = x @ W                                              # [N, H*C]
    xp_q = q(xp).reshape(N, H, C)
    a_d = (xp_q * q(att_dst)[None]).sum(-1)                 # [N, H]
    # src-side logit is computed per-edge from the gathered features (mirrors
    # the kernel's x_src reuse).
    logit_src = (xp_q[src] * q(att_src)[None]).sum(-1)      # [E, H]
    logit = logit_src + q(a_d)[dst]                         # [E, H]
    logit = jnp.where(logit > 0, logit, 0.2 * logit)        # leaky_relu(0.2)
    m = jax.ops.segment_max(logit, dst, num_segments=N)     # [N, H]
    ex = jnp.exp(logit - q(m)[dst])                         # [E, H]
    denom = jax.ops.segment_sum(q(ex), dst, num_segments=N)
    alpha = ex / (q(denom)[dst] + 1e-16)                    # [E, H]
    msg = q(xp_q[src] * q(alpha)[:, :, None])               # [E, H, C]
    out = jax.ops.segment_sum(msg, dst, num_segments=N)
    out = out.reshape(N, H * C) + bias
    return out, alpha


def init_params(key, in_ch, out_ch, heads):
    kW, ks, kd = jax.random.split(key, 3)
    fan_in, fan_out = in_ch, heads * out_ch
    bW = (6.0 / (fan_in + fan_out)) ** 0.5
    W = jax.random.uniform(kW, (in_ch, heads * out_ch), jnp.float32, -bW, bW)
    ba = (6.0 / (1 + out_ch)) ** 0.5
    att_src = jax.random.uniform(ks, (heads, out_ch), jnp.float32, -ba, ba)
    att_dst = jax.random.uniform(kd, (heads, out_ch), jnp.float32, -ba, ba)
    bias = jnp.zeros((heads * out_ch,), jnp.float32)   # PyG zero-inits bias
    return dict(W=W, att_src=att_src, att_dst=att_dst, bias=bias)


if __name__ == "__main__":
    # Small, deterministic problem: N nodes, E directed edges.
    N, E = 12, 24
    input_channels, hidden_channels, heads = 16, 32, 2

    key = jax.random.PRNGKey(0)
    kx, ke1, ke2, kp = jax.random.split(key, 4)
    x = jax.random.normal(kx, (N, input_channels), jnp.float32)
    src = jax.random.randint(ke1, (E,), 0, N)
    dst = jax.random.randint(ke2, (E,), 0, N)
    edge_index = jnp.stack([src, dst], axis=0).astype(jnp.int32)

    params = init_params(kp, input_channels, hidden_channels, heads)

    out, (ei, alpha) = gat_forward(x, edge_index, params,
                                   heads=heads, out_ch=hidden_channels)
    jax.block_until_ready((out, alpha))

    assert out.shape == (N, heads * hidden_channels)
    assert alpha.shape == (E, heads)

    # Tight check vs a reference that rounds to bf16 at the same points the
    # kernel feeds the MXU (validates gather/softmax/scatter structure).
    out_q, alpha_q = _ref_forward(x, edge_index, params, heads=heads,
                                  out_ch=hidden_channels, mxu_dtype=jnp.bfloat16)
    assert jnp.allclose(out, out_q, rtol=2e-3, atol=2e-3)
    assert jnp.allclose(alpha, alpha_q, rtol=2e-3, atol=2e-3)

    # Loose check vs the full-f32 PyG math (bf16 MXU inputs => relaxed tol).
    out_f, alpha_f = _ref_forward(x, edge_index, params, heads=heads,
                                  out_ch=hidden_channels, mxu_dtype=None)
    assert float(jnp.max(jnp.abs(alpha - alpha_f))) < 5e-2
    assert float(jnp.max(jnp.abs(out - out_f))) < 5e-2 * (1.0 + float(jnp.max(jnp.abs(out_f))))

    print("KERNEL_OK")
</pallas_src>

<mosaic_0001>
module attributes {stable_mosaic.version = 11 : i64} {
  func.func @_gatconv_kernel(%arg0: memref<12x16xf32, #tpu.memory_space<vmem>>, %arg1: memref<16x64xf32, #tpu.memory_space<vmem>>, %arg2: memref<64x2xbf16, #tpu.memory_space<vmem>>, %arg3: memref<64x2xbf16, #tpu.memory_space<vmem>>, %arg4: memref<1x64xf32, #tpu.memory_space<vmem>>, %arg5: memref<2x64xbf16, #tpu.memory_space<vmem>>, %arg6: memref<24x1xi32, #tpu.memory_space<vmem>>, %arg7: memref<24x1xi32, #tpu.memory_space<vmem>>, %arg8: memref<12x64xf32, #tpu.memory_space<vmem>>, %arg9: memref<2x24xf32, #tpu.memory_space<vmem>>) attributes {dimension_semantics = [], scalar_prefetch = 0 : i64, scratch_operands = 0 : i64, tpu.core_type = #tpu.core_type<tc>} {
    %0 = tpu.iota {dimensions = array<i32: 1>} : vector<24x12xi32>
    %c0 = arith.constant 0 : index
    %c0_0 = arith.constant 0 : index
    %1 = vector.load %arg6[%c0, %c0_0] : memref<24x1xi32, #tpu.memory_space<vmem>>, vector<24x1xi32>
    %2 = vector.broadcast %1 : vector<24x1xi32> to vector<24x12xi32>
    %3 = arith.cmpi eq, %0, %2 : vector<24x12xi32>
    %4 = arith.extui %3 : vector<24x12xi1> to vector<24x12xi32>
    %5 = arith.sitofp %4 : vector<24x12xi32> to vector<24x12xf32>
    %6 = arith.truncf %5 : vector<24x12xf32> to vector<24x12xbf16>
    %c0_1 = arith.constant 0 : index
    %c0_2 = arith.constant 0 : index
    %7 = vector.load %arg7[%c0_1, %c0_2] : memref<24x1xi32, #tpu.memory_space<vmem>>, vector<24x1xi32>
    %8 = vector.broadcast %7 : vector<24x1xi32> to vector<24x12xi32>
    %9 = arith.cmpi eq, %0, %8 : vector<24x12xi32>
    %10 = arith.extui %9 : vector<24x12xi1> to vector<24x12xi32>
    %11 = arith.sitofp %10 : vector<24x12xi32> to vector<24x12xf32>
    %12 = arith.truncf %11 : vector<24x12xf32> to vector<24x12xbf16>
    %13 = arith.extui %9 : vector<24x12xi1> to vector<24x12xi32>
    %14 = arith.sitofp %13 : vector<24x12xi32> to vector<24x12xf32>
    %cst = arith.constant 1.000000e+30 : f32
    %15 = vector.broadcast %cst : f32 to vector<24x12xf32>
    %16 = arith.mulf %14, %15 : vector<24x12xf32>
    %cst_3 = arith.constant 1.000000e+30 : f32
    %17 = vector.broadcast %cst_3 : f32 to vector<24x12xf32>
    %18 = arith.subf %16, %17 : vector<24x12xf32>
    %c0_4 = arith.constant 0 : index
    %c0_5 = arith.constant 0 : index
    %19 = vector.load %arg0[%c0_4, %c0_5] : memref<12x16xf32, #tpu.memory_space<vmem>>, vector<12x16xf32>
    %c0_6 = arith.constant 0 : index
    %c0_7 = arith.constant 0 : index
    %20 = vector.load %arg1[%c0_6, %c0_7] : memref<16x64xf32, #tpu.memory_space<vmem>>, vector<16x64xf32>
    %cst_8 = arith.constant dense<0.000000e+00> : vector<12x64xf32>
    %21 = tpu.matmul %19, %20, %cst_8 {dimension_numbers = #tpu.dot_dimension_numbers<[1], [0], [0], [1], [0, 0, 1, 1], [], []>} : vector<12x16xf32>, vector<16x64xf32>, vector<12x64xf32> -> vector<12x64xf32>
    %22 = arith.truncf %21 : vector<12x64xf32> to vector<12x64xbf16>
    %cst_9 = arith.constant dense<0.000000e+00> : vector<24x64xf32>
    %23 = tpu.matmul %6, %22, %cst_9 {dimension_numbers = #tpu.dot_dimension_numbers<[1], [0], [0], [1], [0, 0, 1, 1], [], []>} : vector<24x12xbf16>, vector<12x64xbf16>, vector<24x64xf32> -> vector<24x64xf32>
    %24 = arith.truncf %23 : vector<24x64xf32> to vector<24x64xbf16>
    %c0_10 = arith.constant 0 : index
    %c0_11 = arith.constant 0 : index
    %25 = vector.load %arg3[%c0_10, %c0_11] : memref<64x2xbf16, #tpu.memory_space<vmem>>, vector<64x2xbf16>
    %cst_12 = arith.constant dense<0.000000e+00> : vector<12x2xf32>
    %26 = tpu.matmul %22, %25, %cst_12 {dimension_numbers = #tpu.dot_dimension_numbers<[1], [0], [0], [1], [0, 0, 1, 1], [], []>} : vector<12x64xbf16>, vector<64x2xbf16>, vector<12x2xf32> -> vector<12x2xf32>
    %c0_13 = arith.constant 0 : index
    %c0_14 = arith.constant 0 : index
    %27 = vector.load %arg2[%c0_13, %c0_14] : memref<64x2xbf16, #tpu.memory_space<vmem>>, vector<64x2xbf16>
    %cst_15 = arith.constant dense<0.000000e+00> : vector<24x2xf32>
    %28 = tpu.matmul %24, %27, %cst_15 {dimension_numbers = #tpu.dot_dimension_numbers<[1], [0], [0], [1], [0, 0, 1, 1], [], []>} : vector<24x64xbf16>, vector<64x2xbf16>, vector<24x2xf32> -> vector<24x2xf32>
    %29 = arith.truncf %26 : vector<12x2xf32> to vector<12x2xbf16>
    %cst_16 = arith.constant dense<0.000000e+00> : vector<24x2xf32>
    %30 = tpu.matmul %12, %29, %cst_16 {dimension_numbers = #tpu.dot_dimension_numbers<[1], [0], [0], [1], [0, 0, 1, 1], [], []>} : vector<24x12xbf16>, vector<12x2xbf16>, vector<24x2xf32> -> vector<24x2xf32>
    %31 = arith.addf %28, %30 : vector<24x2xf32>
    %cst_17 = arith.constant 0.000000e+00 : f32
    %32 = vector.broadcast %cst_17 : f32 to vector<24x2xf32>
    %33 = arith.cmpf ogt, %31, %32 : vector<24x2xf32>
    %cst_18 = arith.constant 2.000000e-01 : f32
    %34 = vector.broadcast %cst_18 : f32 to vector<24x2xf32>
    %35 = arith.mulf %34, %31 : vector<24x2xf32>
    %36 = arith.select %33, %31, %35 : vector<24x2xi1>, vector<24x2xf32>
    %37 = vector.extract_strided_slice %36 {offsets = [0, 0], sizes = [24, 1], strides = [1, 1]} : vector<24x2xf32> to vector<24x1xf32>
    %38 = vector.broadcast %37 : vector<24x1xf32> to vector<24x12xf32>
    %39 = arith.addf %38, %18 : vector<24x12xf32>
    %cst_19 = arith.constant dense<0xFF800000> : vector<12xf32>
    %40 = vector.multi_reduction <maximumf>, %39, %cst_19 [0] : vector<24x12xf32> to vector<12xf32>
    %41 = vector.shape_cast %40 : vector<12xf32> to vector<1x12xf32>
    %42 = vector.extract_strided_slice %36 {offsets = [0, 1], sizes = [24, 1], strides = [1, 1]} : vector<24x2xf32> to vector<24x1xf32>
    %43 = vector.broadcast %42 : vector<24x1xf32> to vector<24x12xf32>
    %44 = arith.addf %43, %18 : vector<24x12xf32>
    %cst_20 = arith.constant dense<0xFF800000> : vector<12xf32>
    %45 = vector.multi_reduction <maximumf>, %44, %cst_20 [0] : vector<24x12xf32> to vector<12xf32>
    %46 = vector.shape_cast %45 : vector<12xf32> to vector<1x12xf32>
    %47 = tpu.concatenate %41, %46 in 0 : vector<1x12xf32>, vector<1x12xf32> -> vector<2x12xf32>
    %48 = arith.truncf %47 : vector<2x12xf32> to vector<2x12xbf16>
    %cst_21 = arith.constant dense<0.000000e+00> : vector<24x2xf32>
    %49 = tpu.matmul %12, %48, %cst_21 {dimension_numbers = #tpu.dot_dimension_numbers<[1], [1], [0], [0], [0, 0, 1, 0], [], []>} : vector<24x12xbf16>, vector<2x12xbf16>, vector<24x2xf32> -> vector<24x2xf32>
    %50 = arith.subf %36, %49 : vector<24x2xf32>
    %51 = math.exp %50 : vector<24x2xf32>
    %52 = arith.truncf %51 : vector<24x2xf32> to vector<24x2xbf16>
    %cst_22 = arith.constant dense<0.000000e+00> : vector<12x2xf32>
    %53 = tpu.matmul %12, %52, %cst_22 {dimension_numbers = #tpu.dot_dimension_numbers<[0], [0], [1], [1], [0, 1, 1, 1], [], []>} : vector<24x12xbf16>, vector<24x2xbf16>, vector<12x2xf32> -> vector<12x2xf32>
    %54 = arith.truncf %53 : vector<12x2xf32> to vector<12x2xbf16>
    %cst_23 = arith.constant dense<0.000000e+00> : vector<24x2xf32>
    %55 = tpu.matmul %12, %54, %cst_23 {dimension_numbers = #tpu.dot_dimension_numbers<[1], [0], [0], [1], [0, 0, 1, 1], [], []>} : vector<24x12xbf16>, vector<12x2xbf16>, vector<24x2xf32> -> vector<24x2xf32>
    %cst_24 = arith.constant 1.000000e-16 : f32
    %56 = vector.broadcast %cst_24 : f32 to vector<24x2xf32>
    %57 = arith.addf %55, %56 : vector<24x2xf32>
    %58 = arith.divf %51, %57 : vector<24x2xf32>
    %59 = tpu.transpose %58, [1, 0] : vector<24x2xf32> -> vector<2x24xf32>
    %c0_25 = arith.constant 0 : index
    %c0_26 = arith.constant 0 : index
    %60 = vector.load %arg9[%c0_25, %c0_26] : memref<2x24xf32, #tpu.memory_space<vmem>>, vector<2x24xf32>
    tpu.vector_store %arg9[%c0_25, %c0_26], %59 {strides = array<i32>} : memref<2x24xf32, #tpu.memory_space<vmem>>, vector<2x24xf32>,
    %61 = arith.truncf %58 : vector<24x2xf32> to vector<24x2xbf16>
    %c0_27 = arith.constant 0 : index
    %c0_28 = arith.constant 0 : index
    %62 = vector.load %arg5[%c0_27, %c0_28] : memref<2x64xbf16, #tpu.memory_space<vmem>>, vector<2x64xbf16>
    %cst_29 = arith.constant dense<0.000000e+00> : vector<24x64xf32>
    %63 = tpu.matmul %61, %62, %cst_29 {dimension_numbers = #tpu.dot_dimension_numbers<[1], [0], [0], [1], [0, 0, 1, 1], [], []>} : vector<24x2xbf16>, vector<2x64xbf16>, vector<24x64xf32> -> vector<24x64xf32>
    %64 = arith.mulf %23, %63 : vector<24x64xf32>
    %65 = arith.truncf %64 : vector<24x64xf32> to vector<24x64xbf16>
    %cst_30 = arith.constant dense<0.000000e+00> : vector<12x64xf32>
    %66 = tpu.matmul %12, %65, %cst_30 {dimension_numbers = #tpu.dot_dimension_numbers<[0], [0], [1], [1], [0, 1, 1, 1], [], []>} : vector<24x12xbf16>, vector<24x64xbf16>, vector<12x64xf32> -> vector<12x64xf32>
    %c0_31 = arith.constant 0 : index
    %c0_32 = arith.constant 0 : index
    %67 = vector.load %arg4[%c0_31, %c0_32] : memref<1x64xf32, #tpu.memory_space<vmem>>, vector<1x64xf32>
    %68 = vector.broadcast %67 : vector<1x64xf32> to vector<12x64xf32>
    %69 = arith.addf %66, %68 : vector<12x64xf32>
    %c0_33 = arith.constant 0 : index
    %c0_34 = arith.constant 0 : index
    %70 = vector.load %arg8[%c0_33, %c0_34] : memref<12x64xf32, #tpu.memory_space<vmem>>, vector<12x64xf32>
    tpu.vector_store %arg8[%c0_33, %c0_34], %69 {strides = array<i32>} : memref<12x64xf32, #tpu.memory_space<vmem>>, vector<12x64xf32>,
    return
  }
}

</mosaic_0001>

<bundles_post_ra>
// kernel: tpu_custom_call.1
= control target key start
LH: loop header
LB: loop body
LE: loop exit
PB: predicated region body
PF: predicated region fallthrough
CT: control target
= control target key end

     0   :  { %15 = vsyncpa [#allocation3], 0  ;;  %vm92_vm0 = vcmask 130048   ;;  %v762_v3 = vmov 0   ;;  %s961_s0 = inlined_call_operand.vmem [shape: f32[12,16], index: 0, kind: input, shape index: {}]   ;;  %s962_s1 = inlined_call_operand.vmem [shape: f32[16,64], index: 1, kind: input, shape index: {}]   ;;  %s963_s2 = inlined_call_operand.vmem [shape: bf16[64,2], index: 2, kind: input, shape index: {}]   ;;  %s964_s3 = inlined_call_operand.vmem [shape: bf16[64,2], index: 3, kind: input, shape index: {}]   ;;  %s965_s4 = inlined_call_operand.vmem [shape: f32[1,64], index: 4, kind: input, shape index: {}]   ;;  %s966_s5 = inlined_call_operand.vmem [shape: bf16[2,64], index: 5, kind: input, shape index: {}]   ;;  %s967_s6 = inlined_call_operand.vmem [shape: s32[24,1], index: 6, kind: input, shape index: {}]   ;;  %s968_s7 = inlined_call_operand.vmem [shape: s32[24,1], index: 7, kind: input, shape index: {}]   ;;  %s969_s8 = inlined_call_operand.hbm [shape: f32[12,64], index: 8, kind: output, shape index: {0}]   ;;  %s970_s9 = inlined_call_operand.hbm [shape: f32[2,24], index: 9, kind: output, shape index: {1}]  }
   0x1   :  { %v91_v0 = vld [vmem:[%s962_s1 + $0x8] sm:$0xff]  ;;  %v90_v1 = vld [vmem:[%s962_s1] sm:$0xff]  ;;  %692 = vset.pattern.permute.xlu0 %v762_v3  ;;  %693 = vset.pattern.permute.xlu1 %v762_v3  ;;  %v38_v5 = vld [vmem:[%s967_s6 + $0x10] sm:$0xff] }
   0x2   :  { %113 = vmatpush.msra.mxu2 %v91_v0  ;;  %v88_v2 = vld [vmem:[%s961_s0] sm:$0xff]  ;;  %v60_v6 = vld [vmem:[%s968_s7 + $0x8] sm:$0xff]  ;;  %46 = vperm.xlu1 %693, %v38_v5   ;;  %v680_v7 = vld [vmem:[%s964_s3 + $0x18] sm:$0xff] }
   0x3   :  { %v36_v4 = vld [vmem:[%s967_s6] sm:$0xff] }
   0x4   :  { %40 = vperm.xlu0 %692, %v36_v4   ;;  %114 = vmatpush.msra.mxu2 %v90_v1 }
   0x5   :  { %16 = vsyncpa [#allocation5], 0  ;;  %628 = vmatmul.msk.f32.vlgmr.msra.gmra.mxu2 %vm92_vm0, %v88_v2  ;;  %694 = vset.pattern.permute.xlu2 %v762_v3  ;;  %v37_v8 = vld [vmem:[%s967_s6 + $0x8] sm:$0xff]  ;;  %v59_v9 = vld [vmem:[%s968_s7] sm:$0xff]  ;;  %v34_v15 = vlaneseq  ;;  %v763_v21 = vmov 0.0   ;;  %vm186_vm3 = vcmask 523264  }
   0x6   :  { %66 = vperm.xlu2 %694, %v60_v6   ;;  %193 = vmatpush.bf16.msrb.mxu2 %v680_v7  ;;  %v89_v10 = vld [vmem:[%s961_s0 + $0x8] sm:$0xf]  ;;  %v679_v11 = vld [vmem:[%s964_s3 + $0x10] sm:$0xff]  ;;  %v677_v13 = vld [vmem:[%s964_s3] sm:$0xff]  ;;  %vm130_vm4 = vcmask 1045504   ;;  %vm123_vm5 = vcmask 97280  }
   0x7   :  { %v678_v12 = vld [vmem:[%s964_s3 + $0x8] sm:$0xff]  ;;  %v61_v16 = vld [vmem:[%s968_s7 + $0x10] sm:$0xff]  ;;  %v684_v17 = vld [vmem:[%s963_s2 + $0x18] sm:$0xff]  ;;  %v35_v19 = vand.u32 127, %v34_v15  ;;  %v764_v52 = vmov 1   ;;  %vm351_vm13 = vcmask 1040384  }
   0x8   :  { %273 = vmatpush.bf16.msra.mxu0 %v684_v17  ;;  %v683_v31 = vld [vmem:[%s963_s2 + $0x10] sm:$0xff]  ;;  %v682_v32 = vld [vmem:[%s963_s2 + $0x8] sm:$0xff]  ;;  %v681_v33 = vld [vmem:[%s963_s2] sm:$0xff]  ;;  %vm406_vm14 = vcmask 1043456   ;;  %vm402_vm15 = vcmask 195584   ;;  %s605_s22 = sshll.u32 %s970_s9, 4  ;;  %s606_s22 = int_to_ptr.hbm [resolvable:$true] %s605_s22 }
   0x9   :  { %s766_s25 = smov [#allocation2]   ;;  %s591_s9 = sshll.u32 %s969_s8, 4  ;;  %s592_s9 = int_to_ptr.hbm [resolvable:$true] %s591_s9 }
   0xa   :  { %63 = vperm.xlu1 %693, %v59_v9   ;;  %194 = vmatpush.bf16.msrb.mxu2 %v679_v11  ;;  %s589_s26 = sshll.u32 %s766_s25, 4  ;;  %s767_s29 = smov 128   ;;  %s590_s26 = int_to_ptr.vmem [resolvable:$true] %s589_s26 }
   0xb   :  { %s768_s30 = smov 8  }
   0xc   :  { %43 = vperm.xlu0 %692, %v37_v8   ;;  %274 = vmatpush.bf16.msra.mxu0 %v683_v31 }
   0xd   :  { %629 = vmatmul.msk.f32.gmra.mxu2 %vm92_vm0, %v89_v10 }
   0xe   :  { %195 = vmatpush.bf16.msrb.mxu2 %v678_v12  ;;  %69 = vperm.xlu2 %694, %v61_v16  }
  0x10   :  { %275 = vmatpush.bf16.msra.mxu0 %v682_v32 }
  0x12   :  { %196 = vmatpush.bf16.msrb.mxu2 %v677_v13 }
  0x14   :  { %276 = vmatpush.bf16.msra.mxu0 %v681_v33 }
  0x16   :  { %695 = vset.pattern.permute.xlu2 %v764_v52 }
  0x60   :  { %v67_v36 = vpop.permute.xlu2 %66 }
  0x61   :  { %vm72_vm7 = vcmp.eq.s32.totalorder %v35_v19, %v67_v36 }
  0x62   :  { %v623_v42 = vsel %vm72_vm7, 1.0, %v763_v21 }
  0x63   :  { %v83_v9 = vmul.f32 1e+30, %v623_v42 }
  0x68   :  { %v70_v47 = vpop.permute.xlu2 %69 }
  0x69   :  { %vm73_vm9 = vcmp.eq.s32.totalorder %v35_v19, %v70_v47 }
  0x6a   :  { %v624_v50 = vsel %vm73_vm9, 1.0, %v763_v21  ;;  %vm528_vm9 = vcmask 15360  }
  0x6b   :  { %v896_v51 = vpack.c.bf16 %v624_v50, %v624_v50  ;;  %v84_v10 = vmul.f32 1e+30, %v624_v50 }
  0x6d   :  { %v627_v16 = vadd.f32 -1e+30, %v84_v10 }
  0x74   :  { %v47_v28 = vpop.permute.xlu1 %46 }
  0x75   :  { %vm50_vm6 = vcmp.eq.s32.totalorder %v35_v19, %v47_v28 }
  0x76   :  { %v41_v14 = vpop.permute.xlu0 %40  ;;  %v621_v29 = vsel %vm50_vm6, 1.0, %v763_v21 }
  0x77   :  { %vm48_vm1 = vcmp.eq.s32.totalorder %v35_v19, %v41_v14  ;;  %v58_v30 = vpack.c.bf16 %v621_v29, %v621_v29  ;;  %v626_v14 = vadd.f32 -1e+30, %v83_v9 }
  0x78   :  { %v619_v22 = vsel %vm48_vm1, 1.0, %v763_v21 }
  0x7c   :  { %v64_v37 = vpop.permute.xlu1 %63 }
  0x7d   :  { %vm71_vm8 = vcmp.eq.s32.totalorder %v35_v19, %v64_v37 }
  0x7e   :  { %v44_v20 = vpop.permute.xlu0 %43  ;;  %v622_v43 = vsel %vm71_vm8, 1.0, %v763_v21 }
  0x7f   :  { %vm49_vm2 = vcmp.eq.s32.totalorder %v35_v19, %v44_v20  ;;  %v887_v45 = vpack.c.bf16 %v623_v42, %v622_v43  ;;  %v82_v8 = vmul.f32 1e+30, %v622_v43 }
  0x80   :  { %v620_v24 = vsel %vm49_vm2, 1.0, %v763_v21 }
  0x81   :  { %v57_v26 = vpack.c.bf16 %v620_v24, %v619_v22  ;;  %v625_v11 = vadd.f32 -1e+30, %v82_v8 }
  0x88   :  { %v116_v18 = vpop.f32.mrf.mxu2 }
  0x90   :  { %v119_v23 = vpop.f32.mrf.mxu2 }
  0x91   :  { %v122_v25 = vpack.c.bf16 %v119_v23, %v116_v18 }
  0x93   :  { %648 = vmatmul.msk.bf16.vlgmr.msrb.gmra.mxu2 %vm186_vm3, %v122_v25  ;;  %v132_v27 = vsel %vm130_vm4, %v122_v25, 0 }
  0x94   :  { %141 = vmatpush.bf16.msra.mxu1 %v132_v27 }
  0x97   :  { %630 = vmatmul.msk.bf16.vlgmr.msra.gmra.mxu1 %vm123_vm5, %v57_v26 }
  0xa7   :  { %631 = vmatmul.msk.bf16.gmra.mxu1 %vm123_vm5, %v58_v30 }
 0x114   :  { %v879_v34 = vpop.f32.mrf.mxu1 }
 0x116   :  { %v198_v35 = vpop.f32.mrf.mxu2 }
 0x11c   :  { %v881_v38 = vpop.f32.mrf.mxu1 }
 0x11d   :  { %v152_v39 = vpack.c.bf16 %v881_v38, %v879_v34 }
 0x11e   :  { %v200_v40 = vpop.f32.mrf.mxu2 }
 0x11f   :  { %v211_v41 = vpack.c.bf16 %v200_v40, %v198_v35  ;;  %667 = vmatmul.msk.bf16.vlgmr.msra.gmra.mxu0 %vm186_vm3, %v152_v39 }
 0x121   :  { %v219_v44 = vsel %vm130_vm4, %v211_v41, 0 }
 0x122   :  { %228 = vmatpush.bf16.msra.mxu3 %v219_v44 }
 0x124   :  { %v889_v46 = vpop.f32.mrf.mxu1 }
 0x125   :  { %649 = vmatmul.msk.bf16.vlgmr.msra.gmra.mxu3 %vm123_vm5, %v887_v45  ;;  %v153_v48 = vpack.c.bf16 %v889_v46, %v889_v46 }
 0x12c   :  { %v150_v49 = vpop.f32.mrf.mxu1 }
 0x12f   :  { %668 = vmatmul.msk.bf16.gmra.mxu0 %vm186_vm3, %v153_v48 }
 0x135   :  { %650 = vmatmul.msk.bf16.gmra.mxu3 %vm123_vm5, %v896_v51 }
 0x19c   :  { %v278_v53 = vpop.f32.mrf.mxu0 }
 0x1a4   :  { %v280_v54 = vpop.f32.mrf.mxu0 }
 0x1a8   :  { %v230_v55 = vpop.f32.mrf.mxu3 }
 0x1a9   :  { %v279_v56 = vadd.f32 %v278_v53, %v230_v55 }
 0x1ab   :  { %v290_v57 = vmul.f32 0.2, %v279_v56  ;;  %vm287_vm10 = vcmp.gt.f32.partialorder %v279_v56, 0.0 }
 0x1ac   :  { %v283_v58 = vpop.f32.mrf.mxu0 }
 0x1ad   :  { %v900_v59 = vsel %vm287_vm10, %v279_v56, %v290_v57 }
 0x1ae   :  { %326 = vperm.xlu2 %695, %v900_v59   ;;  %298 = vperm.xlu0 %692, %v900_v59  }
 0x1b0   :  { %v232_v60 = vpop.f32.mrf.mxu3 }
 0x1b1   :  { %v281_v61 = vadd.f32 %v280_v54, %v232_v60 }
 0x1b3   :  { %v291_v62 = vmul.f32 0.2, %v281_v61  ;;  %vm288_vm11 = vcmp.gt.f32.partialorder %v281_v61, 0.0 }
 0x1b4   :  { %v285_v63 = vpop.f32.mrf.mxu0 }
 0x1b5   :  { %v904_v0 = vsel %vm288_vm11, %v281_v61, %v291_v62 }
 0x1b6   :  { %303 = vperm.xlu1 %693, %v904_v0   ;;  %696 = vset.pattern.permute.xlu0 %v764_v52 }
 0x1b7   :  { %330 = vperm.xlu0 %696, %v904_v0  }
 0x1b8   :  { %v235_v1 = vpop.f32.mrf.mxu3 }
 0x1b9   :  { %v284_v2 = vadd.f32 %v283_v58, %v235_v1 }
 0x1bb   :  { %v292_v3 = vmul.f32 0.2, %v284_v2  ;;  %vm289_vm12 = vcmp.gt.f32.partialorder %v284_v2, 0.0 }
 0x1bd   :  { %v295_v4 = vsel %vm289_vm12, %v284_v2, %v292_v3 }
 0x1be   :  { %334 = vperm.xlu2 %695, %v295_v4   ;;  %308 = vperm.xlu1 %693, %v295_v4  }
 0x1c0   :  { %v237_v5 = vpop.f32.mrf.mxu3 }
 0x1f3   :  { %386 = vxpose.xlu1.c.b16.start [1/2] (short) (narrow) %v887_v45, 16 }
 0x203   :  { %387 = vxpose.xlu1.c.b16.end [2/2] (short) (narrow) %v896_v51, 16 }
 0x208   :  { %v327_v6 = vpop.permute.xlu2 %326 }
 0x209   :  { %v337_v15 = vadd.f32 %v625_v11, %v327_v6 }
 0x20b   :  { %v340_v24 = vsel %vm123_vm5, %v337_v15, -inf }
 0x218   :  { %v335_v12 = vpop.permute.xlu2 %334 }
 0x219   :  { %v339_v20 = vadd.f32 %v627_v16, %v335_v12 }
 0x21b   :  { %v342_v28 = vsel %vm123_vm5, %v339_v20, -inf }
 0x220   :  { %v299_v7 = vpop.permute.xlu0 %298 }
 0x221   :  { %v311_v13 = vadd.f32 %v625_v11, %v299_v7  ;;  %v527_v11 = vld [vmem:[%s966_s5] sm:$0x1]  ;;  %s765_s5 = smov [#allocation4]  }
 0x222   :  { %v536_v12 = vsel %vm351_vm13, %v527_v11, 0  ;;  %s603_s1 = sshll.u32 %s765_s5, 4  ;;  %s604_s1 = int_to_ptr.vmem [resolvable:$true] %s603_s1 }
 0x223   :  { %v314_v22 = vsel %vm123_vm5, %v311_v13, -inf  ;;  %545 = vmatpush.bf16.msrb.mxu0 %v536_v12 }
 0x228   :  { %v304_v17 = vpop.permute.xlu1 %303 }
 0x229   :  { %v312_v18 = vadd.f32 %v626_v14, %v304_v17  ;;  %v331_v19 = vpop.permute.xlu0 %330 }
 0x22a   :  { %v338_v21 = vadd.f32 %v626_v14, %v331_v19 }
 0x22b   :  { %v315_v23 = vsel %vm123_vm5, %v312_v18, -inf }
 0x22c   :  { %v317_v25 = vmax.f32 %v314_v22, %v315_v23  ;;  %v341_v26 = vsel %vm123_vm5, %v338_v21, -inf }
 0x22d   :  { %v343_v27 = vmax.f32 %v340_v24, %v341_v26 }
 0x22f   :  { %v344_v29 = vmax.f32 %v343_v27, %v342_v28 }
 0x230   :  { %v309_v30 = vpop.permute.xlu1 %308 }
 0x231   :  { %v345_v31 = vrot.slane %v344_v29, 4  ;;  %v313_v32 = vadd.f32 %v627_v16, %v309_v30 }
 0x233   :  { %v346_v33 = vmax.f32 %v344_v29, %v345_v31  ;;  %v316_v35 = vsel %vm123_vm5, %v313_v32, -inf }
 0x234   :  { %v318_v36 = vmax.f32 %v317_v25, %v316_v35 }
 0x235   :  { %v347_v37 = vrot.slane %v346_v33, 2 }
 0x236   :  { %v319_v39 = vrot.slane %v318_v36, 4 }
 0x237   :  { %v348_v40 = vmax.f32 %v346_v33, %v347_v37 }
 0x238   :  { %v320_v41 = vmax.f32 %v318_v36, %v319_v39 }
 0x239   :  { %v349_v43 = vrot.slane %v348_v40, 1 }
 0x23a   :  { %v321_v42 = vrot.slane %v320_v41, 2 }
 0x23b   :  { %v350_v49 = vmax.f32 %v348_v40, %v349_v43 }
 0x23c   :  { %v322_v44 = vmax.f32 %v320_v41, %v321_v42 }
 0x23e   :  { %v323_v47 = vrot.slane %v322_v44, 1 }
 0x240   :  { %v324_v48 = vmax.f32 %v322_v44, %v323_v47 }
 0x242   :  { %v352_v50 = vsel %vm351_vm13, %v324_v48, %v350_v49 }
 0x243   :  { %v353_v52 = vpack.c.bf16 %v352_v50, %v352_v50 }
 0x245   :  { %v355_v53 = vsel %vm123_vm5, %v353_v52, 0 }
 0x246   :  { %364 = vmatpush.bf16.xpose.msra.mxu2 %v355_v53 }
 0x24d   :  { %669 = vmatmul.msk.bf16.vlgmr.msra.gmra.mxu2 %vm123_vm5, %v887_v45 }
 0x25d   :  { %670 = vmatmul.msk.bf16.gmra.mxu2 %vm123_vm5, %v896_v51 }
 0x2d0   :  { %v366_v54 = vpop.f32.mrf.mxu2 }
 0x2d1   :  { %v375_v60 = vsub.f32 %v900_v59, %v366_v54  ;;  %v929_v59 = vpop.trf.xlu1 }
 0x2d3   :  { %v378_v63 = vmul.f32 1.442695, %v375_v60 }
 0x2d8   :  { %v368_v55 = vpop.f32.mrf.mxu2 }
 0x2d9   :  { %v376_v56 = vsub.f32 %v904_v0, %v368_v55 }
 0x2db   :  { %v380_v62 = vmul.f32 1.442695, %v376_v56 }
 0x2e0   :  { %v371_v57 = vpop.f32.mrf.mxu2 }
 0x2e1   :  { %v377_v58 = vsub.f32 %v295_v4, %v371_v57 }
 0x2e3   :  { %v382_v61 = vmul.f32 1.442695, %v377_v58 }
 0x2e5   :  { %698 = vpow2.f32 %v382_v61 }
 0x2e6   :  { %700 = vpow2.f32 %v380_v62 }
 0x2e7   :  { %702 = vpow2.f32 %v378_v63 }
 0x2e8   :  { %v373_v1 = vpop.f32.mrf.mxu2 }
 0x2eb   :  { %v924_v2 = vpop.eup %698 }
 0x2ec   :  { %v385_v3 = vpack.c.bf16 %v924_v2, %v924_v2  ;;  %v701_v5 = vpop.eup %700 }
 0x2ed   :  { %v703_v4 = vpop.eup %702 }
 0x2ee   :  { %v408_v0 = vsel %vm406_vm14, %v385_v3, 0  ;;  %v384_v6 = vpack.c.bf16 %v701_v5, %v703_v4 }
 0x2ef   :  { %416 = vmatpush.bf16.msrb.mxu1 %v408_v0 }
 0x2f3   :  { %417 = vmatpush.bf16.msrb.mxu1 %v384_v6 }
 0x2f6   :  { %671 = vmatmul.msk.bf16.vlgmr.msrb.gmra.mxu1 %vm402_vm15, %v929_v59 }
 0x373   :  { %v419_v7 = vpop.f32.mrf.mxu1 }
 0x37b   :  { %v421_v8 = vpop.f32.mrf.mxu1 }
 0x37c   :  { %v424_v9 = vpack.c.bf16 %v421_v8, %v419_v7 }
 0x37e   :  { %v426_v10 = vsel %vm130_vm4, %v424_v9, 0 }
 0x37f   :  { %435 = vmatpush.bf16.msrb.mxu3 %v426_v10 }
 0x382   :  { %672 = vmatmul.msk.bf16.vlgmr.msrb.gmra.mxu3 %vm123_vm5, %v887_v45 }
 0x392   :  { %673 = vmatmul.msk.bf16.gmra.mxu3 %vm123_vm5, %v896_v51 }
 0x405   :  { %v437_v13 = vpop.f32.mrf.mxu3 }
 0x406   :  { %v438_v14 = vadd.f32 1e-16, %v437_v13 }
 0x408   :  { %704 = vrcp.f32 %v438_v14  ;;  %v457_v45 = vand.u32 2147483648, %v438_v14  ;;  %v455_v51 = vand.u32 2147483647, %v438_v14  ;;  %vm451_vm1 = vweird.f32 %v438_v14 }
 0x40a   :  { %v458_v25 = vor.u32 1.1754944e-38, %v457_v45  ;;  %vm456_vm4 = vcmp.eq.f32.partialorder %v455_v51, 8.507059e+37 }
 0x40d   :  { %v439_v15 = vpop.f32.mrf.mxu3 }
 0x40e   :  { %v705_v16 = vpop.eup %704  ;;  %v440_v17 = vadd.f32 1e-16, %v439_v15 }
 0x40f   :  { %v447_v18 = vmul.f32 %v705_v16, %v438_v14  ;;  %vm452_vm0 = vweird.f32 %v705_v16 }
 0x410   :  { %706 = vrcp.f32 %v440_v17  ;;  %vm453_vm2 = vmor %vm451_vm1, %vm452_vm0  ;;  %v472_v31 = vand.u32 2147483648, %v440_v17  ;;  %v470_v33 = vand.u32 2147483647, %v440_v17  ;;  %vm466_vm6 = vweird.f32 %v440_v17 }
 0x411   :  { %v448_v19 = vsub.f32 1.0, %v447_v18  ;;  %vm523_vm0 = vcmask 189440  }
 0x412   :  { %v473_v39 = vor.u32 1.1754944e-38, %v472_v31  ;;  %vm471_vm8 = vcmp.eq.f32.partialorder %v470_v33, 8.507059e+37 }
 0x413   :  { %v449_v20 = vmul.f32 %v705_v16, %v448_v19 }
 0x415   :  { %v442_v21 = vpop.f32.mrf.mxu3  ;;  %v450_v22 = vadd.f32 %v705_v16, %v449_v20 }
 0x416   :  { %v707_v23 = vpop.eup %706  ;;  %v443_v24 = vadd.f32 1e-16, %v442_v21 }
 0x417   :  { %v462_v26 = vmul.f32 %v707_v23, %v440_v17  ;;  %v454_v27 = vsel %vm453_vm2, %v705_v16, %v450_v22  ;;  %vm467_vm5 = vweird.f32 %v707_v23 }
 0x418   :  { %708 = vrcp.f32 %v443_v24  ;;  %v459_v28 = vsel %vm456_vm4, %v458_v25, %v454_v27  ;;  %vm468_vm7 = vmor %vm466_vm6, %vm467_vm5  ;;  %v487_v47 = vand.u32 2147483648, %v443_v24  ;;  %v485_v50 = vand.u32 2147483647, %v443_v24 }
 0x419   :  { %v463_v29 = vsub.f32 1.0, %v462_v26  ;;  %v460_v30 = vmul.f32 %v703_v4, %v459_v28  ;;  %vm481_vm11 = vweird.f32 %v443_v24 }
 0x41a   :  { %v488_v53 = vor.u32 1.1754944e-38, %v487_v47  ;;  %vm486_vm13 = vcmp.eq.f32.partialorder %v485_v50, 8.507059e+37 }
 0x41b   :  { %v464_v32 = vmul.f32 %v707_v23, %v463_v29  ;;  %491 = vxpose.xlu2.b32.start [1/3] (short) (narrow) %v460_v30, 8 }
 0x41d   :  { %v465_v35 = vadd.f32 %v707_v23, %v464_v32  ;;  %v444_v36 = vpop.f32.mrf.mxu3 }
 0x41e   :  { %v709_v37 = vpop.eup %708 }
 0x41f   :  { %v477_v40 = vmul.f32 %v709_v37, %v443_v24  ;;  %v469_v41 = vsel %vm468_vm7, %v707_v23, %v465_v35  ;;  %vm482_vm10 = vweird.f32 %v709_v37 }
 0x420   :  { %v474_v42 = vsel %vm471_vm8, %v473_v39, %v469_v41  ;;  %vm483_vm12 = vmor %vm481_vm11, %vm482_vm10 }
 0x421   :  { %v478_v43 = vsub.f32 1.0, %v477_v40  ;;  %v475_v44 = vmul.f32 %v701_v5, %v474_v42 }
 0x423   :  { %v479_v48 = vmul.f32 %v709_v37, %v478_v43  ;;  %v525_v49 = vpack.c.bf16 %v475_v44, %v460_v30  ;;  %492 = vxpose.xlu2.b32.cont [2/3] (short) (narrow) %v475_v44, 8 }
 0x425   :  { %674 = vmatmul.msk.bf16.vlgmr.msrb.gmra.mxu0 %vm528_vm9, %v525_v49  ;;  %v480_v52 = vadd.f32 %v709_v37, %v479_v48 }
 0x427   :  { %v484_v54 = vsel %vm483_vm12, %v709_v37, %v480_v52 }
 0x428   :  { %v489_v55 = vsel %vm486_vm13, %v488_v53, %v484_v54 }
 0x429   :  { %v490_v56 = vmul.f32 %v924_v2, %v489_v55 }
 0x42b   :  { %493 = vxpose.xlu2.b32.end [3/3] (short) (narrow) %v490_v56, 8  ;;  %v526_v57 = vpack.c.bf16 %v490_v56, %v490_v56 }
 0x435   :  { %675 = vmatmul.msk.bf16.gmra.mxu0 %vm528_vm9, %v526_v57 }
 0x4a2   :  { %v547_v58 = vpop.f32.mrf.mxu0 }
 0x4a3   :  { %v556_v5 = vmul.f32 %v547_v58, %v879_v34  ;;  %v697_v34 = vld [vmem:[%s965_s4] ss:$0 sm:$0xff] }
 0x4aa   :  { %v549_v60 = vpop.f32.mrf.mxu0 }
 0x4ab   :  { %v557_v1 = vmul.f32 %v549_v60, %v881_v38 }
 0x4ad   :  { %v559_v0 = vpack.c.bf16 %v557_v1, %v556_v5 }
 0x4b2   :  { %v552_v61 = vpop.f32.mrf.mxu0 }
 0x4b3   :  { %v558_v62 = vmul.f32 %v552_v61, %v889_v46 }
 0x4b4   :  { %v507_v38 = vpop.trf.xlu2 }
 0x4b5   :  { %v560_v63 = vpack.c.bf16 %v558_v62, %v558_v62  ;;  %524 = vst.msk [vmem:[#allocation4] sm:$0x3] %vm523_vm0, %v507_v38 }
 0x4b6   :  { %608 = dma.vmem_to_hbm [thread:$0]  %s604_s1, 32, %s606_s22, [#allocation5]  }
 0x4b7   :  { %v566_v3 = vsel %vm406_vm14, %v560_v63, 0  ;;  %vm583_vm14 = vcmask 519168  }
 0x4b8   :  { %574 = vmatpush.bf16.msra.mxu1 %v566_v3 }
 0x4ba   :  { %v554_v4 = vpop.f32.mrf.mxu0 }
 0x4bc   :  { %575 = vmatpush.bf16.msra.mxu1 %v559_v0 }
 0x4bf   :  { %676 = vmatmul.msk.bf16.vlgmr.msra.gmra.mxu1 %vm402_vm15, %v929_v59 }
 0x53c   :  { %v577_v46 = vpop.f32.mrf.mxu1 }
 0x53d   :  { %v578_v2 = vadd.f32 %v697_v34, %v577_v46 }
 0x53f   :  { %582 = vst.msk [vmem:[#allocation2] sm:$0xff] %vm186_vm3, %v578_v2 }
 0x544   :  { %v579_v6 = vpop.f32.mrf.mxu1 }
 0x545   :  { %v580_v59 = vadd.f32 %v697_v34, %v579_v6 }
 0x547   :  { %584 = vst.msk [vmem:[#allocation2 + $0x8] sm:$0xf] %vm583_vm14, %v580_v59 }
 0x548   :  { %597 = dma.vmem_to_hbm [thread:$0]  %s590_s26, 256, %s592_s9, [#allocation3], %s767_s29, %s767_s29, %s768_s30  }
 0x549   :  { %758 = dma.done.wait [#allocation3], 256  }
 0x54a   :  { %759 = vsyncadd [#allocation3], 4294967040 }
 0x54b   :  { %760 = dma.done.wait [#allocation5], 32  }
 0x54c   :  { %761 = vsyncadd [#allocation5], 4294967264 }
 0x54d   :  { %617 = vsyncpa [#allocation3], 1 }
 0x54e   :  { %618 = vsyncpa [#allocation5], 1 }

</bundles_post_ra>
